<compile_context>
chip_gen: v7x
topology: tpu7x:2x2x1
jax: 0.10.0
libtpu: 0.0.40
codegen_flags: <defaults>
</compile_context>

<pallas_src>
import jax
import jax.numpy as jnp
from jax.experimental import pallas as pl
from jax.experimental.pallas import tpu as pltpu


def _attention_kernel(x_ref,       # VMEM (TB, L, 2H)  compute dtype
                      len_ref,     # VMEM (TB, 1)      int32
                      w1_ref,      # VMEM (2H, I)      compute dtype
                      b1_ref,      # VMEM (1, I)       f32
                      w2_ref,      # VMEM (I, A)       compute dtype
                      b2_ref,      # VMEM (1, A)       f32
                      expand_ref,  # VMEM (2H, 2H*A)   compute dtype, 0/1
                      tile_ref,    # VMEM (A, 2H*A)    f32, 0/1
                      o_ref):      # VMEM (TB, 2H*A)   f32
    TB, L, twoH = x_ref.shape
    A = w2_ref.shape[1]
    F = expand_ref.shape[1]                      # = 2H * A

    x = x_ref[...]                               # (TB, L, 2H)
    x2 = x.reshape(TB * L, twoH)                 # merge leading dims only (no lane change)

    # intermediate_attention_layer + ReLU   (dropout = identity, eval mode)
    h = jnp.dot(x2, w1_ref[...], preferred_element_type=jnp.float32)
    h = jnp.maximum(h + b1_ref[...], 0.0)        # (TB*L, I) f32

    # final_attention_layer                  (dropout = identity)
    logits = jnp.dot(h.astype(w2_ref.dtype), w2_ref[...],
                     preferred_element_type=jnp.float32) + b2_ref[...]
    logits = logits.reshape(TB, L, A)            # (TB, L, A)

    # softmax over sequence positions (dim=0 of each sentence), valid positions only
    pos = jax.lax.broadcasted_iota(jnp.int32, (TB, L, A), 1)
    valid = pos < len_ref[...].reshape(TB, 1, 1)
    masked = jnp.where(valid, logits, -1e30)
    m = jnp.max(masked, axis=1, keepdims=True)   # (TB, 1, A)
    e = jnp.exp(masked - m)                      # invalid rows underflow to 0
    denom = jnp.sum(e, axis=1, keepdims=True)    # >= 1 whenever length >= 1
    weights = e / denom                          # exact reciprocal (tiny tensor)

    # pooled[b, h*A + a] = sum_l x[b,l,h] * weights[b,l,a], built lane-dense:
    #   x_rep[b,l,f]  = x[b,l, f // A]        via exact 0/1 matmul with expand
    #   w_tile[b,l,f] = weights[b,l, f % A]   via exact 0/1 matmul with tile
    x_rep = jnp.dot(x2, expand_ref[...], preferred_element_type=jnp.float32)
    w_tile = jnp.dot(weights.reshape(TB * L, A), tile_ref[...],
                     preferred_element_type=jnp.float32)
    prod = x_rep.reshape(TB, L, F) * w_tile.reshape(TB, L, F)
    o_ref[...] = jnp.sum(prod, axis=1).astype(o_ref.dtype)   # (TB, F), 128+ lanes


def attention_layers_forward(encoded_batch, text_lengths, params, *,
                             batch_block=64, compute_dtype=jnp.bfloat16):
    """encoded_batch: (B, L, 2H), MUST be zero-padded beyond text_lengths
       (same contract the torch module asserts).
       text_lengths : (B,) int.
       returns      : (B, 2H * A) f32 in torch .view(-1) ordering."""
    w1, b1, w2, b2 = params
    B, L, twoH = encoded_batch.shape
    I = w1.shape[1]
    A = w2.shape[1]
    F = twoH * A

    # Batch block: whole batch if small, else a multiple of 8 so the (TB, 1)
    # lengths block satisfies the (8, 128) tiling rule. Pad B up if needed
    # (padded rows are all-zero x with length 0 -> pooled output is zero).
    if B <= batch_block:
        TB, Bp = B, B
    else:
        TB = max(8, 8 * (batch_block // 8))
        Bp = ((B + TB - 1) // TB) * TB

    x = encoded_batch.astype(compute_dtype)
    lens = text_lengths.astype(jnp.int32).reshape(B, 1)
    if Bp != B:
        x = jnp.pad(x, ((0, Bp - B), (0, 0), (0, 0)))
        lens = jnp.pad(lens, ((0, Bp - B), (0, 0)))

    w1c = w1.astype(compute_dtype)
    w2c = w2.astype(compute_dtype)
    b1c = b1.astype(jnp.float32)
    b2c = b2.astype(jnp.float32)

    # Constant 0/1 selection matrices (host-side, concrete) for the lane-dense
    # torch-order pooling: expand replicates each feature A times along lanes,
    # tile repeats the A head-weights 2H times along lanes.
    f_idx = jnp.arange(F)
    expand = (f_idx[None, :] // A == jnp.arange(twoH)[:, None]).astype(compute_dtype)
    tile = (f_idx[None, :] % A == jnp.arange(A)[:, None]).astype(jnp.float32)

    itemsize = jnp.dtype(compute_dtype).itemsize
    cost = pl.CostEstimate(
        flops=2 * Bp * L * (twoH * I + I * A + twoH * F + A * F) + Bp * L * F,
        transcendentals=Bp * L * A,
        bytes_accessed=(Bp * L * twoH * itemsize + Bp * 4
                        + (twoH * I + I * A + twoH * F) * itemsize
                        + (I + A + A * F) * 4 + Bp * F * 4),
    )

    # Per-step VMEM budget: double-buffered x / lens / out blocks, resident
    # weights (pipeline default 2 buffers), plus in-kernel f32 intermediates.
    vmem_needed = (2 * (TB * L * twoH * itemsize + TB * 4 + TB * F * 4)
                   + 2 * ((twoH * I + I * A + twoH * F) * itemsize
                          + (I + A + A * F) * 4)
                   + 3 * TB * L * F * 4
                   + (4 << 20))
    compiler_params = pltpu.CompilerParams(
        dimension_semantics=("parallel",),
        vmem_limit_bytes=int(vmem_needed) if vmem_needed > (16 << 20) else None,
    )

    out = pl.pallas_call(
        _attention_kernel,
        out_shape=jax.ShapeDtypeStruct((Bp, F), jnp.float32),
        grid=(Bp // TB,),
        in_specs=[
            pl.BlockSpec((TB, L, twoH), lambda i: (i, 0, 0)),
            pl.BlockSpec((TB, 1),       lambda i: (i, 0)),
            # Weights/biases/selection matrices: constant block index -> resident in VMEM.
            pl.BlockSpec((twoH, I),     lambda i: (0, 0)),
            pl.BlockSpec((1, I),        lambda i: (0, 0)),
            pl.BlockSpec((I, A),        lambda i: (0, 0)),
            pl.BlockSpec((1, A),        lambda i: (0, 0)),
            pl.BlockSpec((twoH, F),     lambda i: (0, 0)),
            pl.BlockSpec((A, F),        lambda i: (0, 0)),
        ],
        out_specs=pl.BlockSpec((TB, F), lambda i: (i, 0)),
        compiler_params=compiler_params,
        cost_estimate=cost,
    )(x, lens, w1c, b1c, w2c, b2c, expand, tile)

    return out[:B]                               # drop batch padding; already torch order


def init_params(key, encoding_hidden_size, attention_intermediate_size,
                number_of_attention_heads):
    """Deterministic init mimicking nn.Linear default (uniform +-1/sqrt(fan_in))."""
    twoH = encoding_hidden_size * 2
    I = attention_intermediate_size
    A = number_of_attention_heads
    k1, k2, k3, k4 = jax.random.split(key, 4)
    lim1 = 1.0 / jnp.sqrt(twoH)
    lim2 = 1.0 / jnp.sqrt(I)
    w1 = jax.random.uniform(k1, (twoH, I), jnp.float32, -lim1, lim1)
    b1 = jax.random.uniform(k2, (1, I),    jnp.float32, -lim1, lim1)
    w2 = jax.random.uniform(k3, (I, A),    jnp.float32, -lim2, lim2)
    b2 = jax.random.uniform(k4, (1, A),    jnp.float32, -lim2, lim2)
    return w1, b1, w2, b2


def _reference(encoded_batch, text_lengths, params):
    """Pure-JAX reference replicating the per-sentence torch loop (f32)."""
    w1, b1, w2, b2 = params
    B = encoded_batch.shape[0]
    outs = []
    for b in range(B):
        n = int(text_lengths[b])
        xb = encoded_batch[b, :n, :].astype(jnp.float32)
        h = jnp.maximum(xb @ w1 + b1, 0.0)
        logits = h @ w2 + b2
        w = jax.nn.softmax(logits, axis=0)
        outs.append((xb.T @ w).reshape(-1))
    return jnp.stack(outs, axis=0)


if __name__ == "__main__":
    encoding_hidden_size = 16        # -> feature dim 2H = 32
    attention_intermediate_size = 32
    number_of_attention_heads = 4    # 2H * A = 128 (lane-dense output)
    twoH = encoding_hidden_size * 2

    key = jax.random.PRNGKey(0)
    kp, kx1, kx2, kl = jax.random.split(key, 4)
    params = init_params(kp, encoding_hidden_size,
                         attention_intermediate_size,
                         number_of_attention_heads)

    def make_inputs(k, B, L, lengths):
        xx = jax.random.normal(k, (B, L, twoH), dtype=jnp.float32)
        pos = jnp.arange(L)[None, :, None]
        return jnp.where(pos < lengths[:, None, None], xx, 0.0)  # zero padding

    # Case 1: f32 path, tiny batch -> whole batch in a single grid step.
    B1, L1 = 2, 8
    lens1 = jnp.array([8, 5], dtype=jnp.int32)
    x1 = make_inputs(kx1, B1, L1, lens1)
    out1 = jax.block_until_ready(
        attention_layers_forward(x1, lens1, params, compute_dtype=jnp.float32))
    ref1 = _reference(x1, lens1, params)
    assert out1.shape == (B1, twoH * number_of_attention_heads)
    assert jnp.allclose(out1, ref1, atol=5e-3, rtol=5e-3), (
        f"case1 max err {jnp.max(jnp.abs(out1 - ref1))}")

    # Case 2: bf16 activations/weights, batch-blocked grid with padding.
    B2, L2 = 20, 8
    lens2 = jax.random.randint(kl, (B2,), 1, L2 + 1).astype(jnp.int32)
    x2 = make_inputs(kx2, B2, L2, lens2)
    out2 = jax.block_until_ready(
        attention_layers_forward(x2, lens2, params, batch_block=16,
                                 compute_dtype=jnp.bfloat16))
    ref2 = _reference(x2, lens2, params)
    assert out2.shape == (B2, twoH * number_of_attention_heads)
    # tolerance reflects bf16 matmul operands (f32 accumulation kept)
    assert jnp.allclose(out2, ref2, atol=5e-2, rtol=5e-2), (
        f"case2 max err {jnp.max(jnp.abs(out2 - ref2))}")

    print("KERNEL_OK")
</pallas_src>

<mosaic_0001>
module attributes {stable_mosaic.version = 11 : i64} {
  func.func @_attention_kernel(%arg0: i32, %arg1: memref<2x8x32xf32, #tpu.memory_space<vmem>>, %arg2: memref<2x1xi32, #tpu.memory_space<vmem>>, %arg3: memref<32x32xf32, #tpu.memory_space<vmem>>, %arg4: memref<1x32xf32, #tpu.memory_space<vmem>>, %arg5: memref<32x4xf32, #tpu.memory_space<vmem>>, %arg6: memref<1x4xf32, #tpu.memory_space<vmem>>, %arg7: memref<32x128xf32, #tpu.memory_space<vmem>>, %arg8: memref<4x128xf32, #tpu.memory_space<vmem>>, %arg9: memref<2x128xf32, #tpu.memory_space<vmem>>) attributes {dimension_semantics = [#tpu.dimension_semantics<parallel>], iteration_bounds = array<i64: 1>, scalar_prefetch = 0 : i64, scratch_operands = 0 : i64, tpu.core_type = #tpu.core_type<tc>, window_params = [{transform_indices = @transform_0, window_bounds = array<i64: 2, 8, 32>}, {transform_indices = @transform_1, window_bounds = array<i64: 2, 1>}, {pipeline_mode = #tpu.pipeline_mode<synchronous>, transform_indices = @transform_2, window_bounds = array<i64: 32, 32>}, {pipeline_mode = #tpu.pipeline_mode<synchronous>, transform_indices = @transform_3, window_bounds = array<i64: 1, 32>}, {pipeline_mode = #tpu.pipeline_mode<synchronous>, transform_indices = @transform_4, window_bounds = array<i64: 32, 4>}, {pipeline_mode = #tpu.pipeline_mode<synchronous>, transform_indices = @transform_5, window_bounds = array<i64: 1, 4>}, {pipeline_mode = #tpu.pipeline_mode<synchronous>, transform_indices = @transform_6, window_bounds = array<i64: 32, 128>}, {pipeline_mode = #tpu.pipeline_mode<synchronous>, transform_indices = @transform_7, window_bounds = array<i64: 4, 128>}, {transform_indices = @transform_8, window_bounds = array<i64: 2, 128>}]} {
    %c0 = arith.constant 0 : index
    %c0_0 = arith.constant 0 : index
    %c0_1 = arith.constant 0 : index
    %0 = vector.load %arg1[%c0, %c0_0, %c0_1] : memref<2x8x32xf32, #tpu.memory_space<vmem>>, vector<2x8x32xf32>
    %1 = vector.shape_cast %0 : vector<2x8x32xf32> to vector<16x32xf32>
    %c0_2 = arith.constant 0 : index
    %c0_3 = arith.constant 0 : index
    %2 = vector.load %arg3[%c0_2, %c0_3] : memref<32x32xf32, #tpu.memory_space<vmem>>, vector<32x32xf32>
    %cst = arith.constant dense<0.000000e+00> : vector<16x32xf32>
    %3 = tpu.matmul %1, %2, %cst {dimension_numbers = #tpu.dot_dimension_numbers<[1], [0], [0], [1], [0, 0, 1, 1], [], []>} : vector<16x32xf32>, vector<32x32xf32>, vector<16x32xf32> -> vector<16x32xf32>
    %c0_4 = arith.constant 0 : index
    %c0_5 = arith.constant 0 : index
    %4 = vector.load %arg4[%c0_4, %c0_5] : memref<1x32xf32, #tpu.memory_space<vmem>>, vector<1x32xf32>
    %5 = vector.broadcast %4 : vector<1x32xf32> to vector<16x32xf32>
    %6 = arith.addf %3, %5 : vector<16x32xf32>
    %cst_6 = arith.constant 0.000000e+00 : f32
    %7 = vector.broadcast %cst_6 : f32 to vector<16x32xf32>
    %8 = arith.maximumf %6, %7 : vector<16x32xf32>
    %c0_7 = arith.constant 0 : index
    %c0_8 = arith.constant 0 : index
    %9 = vector.load %arg5[%c0_7, %c0_8] : memref<32x4xf32, #tpu.memory_space<vmem>>, vector<32x4xf32>
    %cst_9 = arith.constant dense<0.000000e+00> : vector<16x4xf32>
    %10 = tpu.matmul %8, %9, %cst_9 {dimension_numbers = #tpu.dot_dimension_numbers<[1], [0], [0], [1], [0, 0, 1, 1], [], []>} : vector<16x32xf32>, vector<32x4xf32>, vector<16x4xf32> -> vector<16x4xf32>
    %c0_10 = arith.constant 0 : index
    %c0_11 = arith.constant 0 : index
    %11 = vector.load %arg6[%c0_10, %c0_11] : memref<1x4xf32, #tpu.memory_space<vmem>>, vector<1x4xf32>
    %12 = vector.broadcast %11 : vector<1x4xf32> to vector<16x4xf32>
    %13 = arith.addf %10, %12 : vector<16x4xf32>
    %14 = vector.shape_cast %13 : vector<16x4xf32> to vector<2x8x4xf32>
    %15 = tpu.iota {dimensions = array<i32: 1>} : vector<2x8x4xi32>
    %c0_12 = arith.constant 0 : index
    %c0_13 = arith.constant 0 : index
    %16 = vector.load %arg2[%c0_12, %c0_13] : memref<2x1xi32, #tpu.memory_space<vmem>>, vector<2x1xi32>
    %17 = vector.shape_cast %16 : vector<2x1xi32> to vector<2x1x1xi32>
    %18 = vector.broadcast %17 : vector<2x1x1xi32> to vector<2x8x4xi32>
    %19 = arith.cmpi slt, %15, %18 : vector<2x8x4xi32>
    %cst_14 = arith.constant -1.000000e+30 : f32
    %20 = vector.broadcast %cst_14 : f32 to vector<2x8x4xf32>
    %21 = arith.select %19, %14, %20 : vector<2x8x4xi1>, vector<2x8x4xf32>
    %cst_15 = arith.constant dense<0xFF800000> : vector<2x4xf32>
    %22 = vector.multi_reduction <maximumf>, %21, %cst_15 [1] : vector<2x8x4xf32> to vector<2x4xf32>
    %23 = vector.shape_cast %22 : vector<2x4xf32> to vector<2x1x4xf32>
    %24 = vector.broadcast %23 : vector<2x1x4xf32> to vector<2x8x4xf32>
    %25 = arith.subf %21, %24 : vector<2x8x4xf32>
    %26 = math.exp %25 : vector<2x8x4xf32>
    %cst_16 = arith.constant dense<0.000000e+00> : vector<2x4xf32>
    %27 = vector.multi_reduction <add>, %26, %cst_16 [1] : vector<2x8x4xf32> to vector<2x4xf32>
    %28 = vector.shape_cast %27 : vector<2x4xf32> to vector<2x1x4xf32>
    %29 = vector.broadcast %28 : vector<2x1x4xf32> to vector<2x8x4xf32>
    %30 = arith.divf %26, %29 : vector<2x8x4xf32>
    %c0_17 = arith.constant 0 : index
    %c0_18 = arith.constant 0 : index
    %31 = vector.load %arg7[%c0_17, %c0_18] : memref<32x128xf32, #tpu.memory_space<vmem>>, vector<32x128xf32>
    %cst_19 = arith.constant dense<0.000000e+00> : vector<16x128xf32>
    %32 = tpu.matmul %1, %31, %cst_19 {dimension_numbers = #tpu.dot_dimension_numbers<[1], [0], [0], [1], [0, 0, 1, 1], [], []>} : vector<16x32xf32>, vector<32x128xf32>, vector<16x128xf32> -> vector<16x128xf32>
    %33 = vector.shape_cast %30 : vector<2x8x4xf32> to vector<16x4xf32>
    %c0_20 = arith.constant 0 : index
    %c0_21 = arith.constant 0 : index
    %34 = vector.load %arg8[%c0_20, %c0_21] : memref<4x128xf32, #tpu.memory_space<vmem>>, vector<4x128xf32>
    %cst_22 = arith.constant dense<0.000000e+00> : vector<16x128xf32>
    %35 = tpu.matmul %33, %34, %cst_22 {dimension_numbers = #tpu.dot_dimension_numbers<[1], [0], [0], [1], [0, 0, 1, 1], [], []>} : vector<16x4xf32>, vector<4x128xf32>, vector<16x128xf32> -> vector<16x128xf32>
    %36 = vector.shape_cast %32 : vector<16x128xf32> to vector<2x8x128xf32>
    %37 = vector.shape_cast %35 : vector<16x128xf32> to vector<2x8x128xf32>
    %38 = arith.mulf %36, %37 : vector<2x8x128xf32>
    %cst_23 = arith.constant dense<0.000000e+00> : vector<2x128xf32>
    %39 = vector.multi_reduction <add>, %38, %cst_23 [1] : vector<2x8x128xf32> to vector<2x128xf32>
    %c0_24 = arith.constant 0 : index
    %c0_25 = arith.constant 0 : index
    %40 = vector.load %arg9[%c0_24, %c0_25] : memref<2x128xf32, #tpu.memory_space<vmem>>, vector<2x128xf32>
    tpu.vector_store %arg9[%c0_24, %c0_25], %39 {strides = array<i32>} : memref<2x128xf32, #tpu.memory_space<vmem>>, vector<2x128xf32>,
    return
  }
  func.func @transform_0(%arg0: i32) -> (i32, i32, i32) {
    %c0_i32 = arith.constant 0 : i32
    %c0_i32_0 = arith.constant 0 : i32
    %c0_i32_1 = arith.constant 0 : i32
    return %arg0, %c0_i32, %c0_i32_0 : i32, i32, i32
  }
  func.func @transform_1(%arg0: i32) -> (i32, i32) {
    %c0_i32 = arith.constant 0 : i32
    %c0_i32_0 = arith.constant 0 : i32
    return %arg0, %c0_i32 : i32, i32
  }
  func.func @transform_2(%arg0: i32) -> (i32, i32) {
    %c0_i32 = arith.constant 0 : i32
    %c0_i32_0 = arith.constant 0 : i32
    %c0_i32_1 = arith.constant 0 : i32
    return %c0_i32, %c0_i32_0 : i32, i32
  }
  func.func @transform_3(%arg0: i32) -> (i32, i32) {
    %c0_i32 = arith.constant 0 : i32
    %c0_i32_0 = arith.constant 0 : i32
    %c0_i32_1 = arith.constant 0 : i32
    return %c0_i32, %c0_i32_0 : i32, i32
  }
  func.func @transform_4(%arg0: i32) -> (i32, i32) {
    %c0_i32 = arith.constant 0 : i32
    %c0_i32_0 = arith.constant 0 : i32
    %c0_i32_1 = arith.constant 0 : i32
    return %c0_i32, %c0_i32_0 : i32, i32
  }
  func.func @transform_5(%arg0: i32) -> (i32, i32) {
    %c0_i32 = arith.constant 0 : i32
    %c0_i32_0 = arith.constant 0 : i32
    %c0_i32_1 = arith.constant 0 : i32
    return %c0_i32, %c0_i32_0 : i32, i32
  }
  func.func @transform_6(%arg0: i32) -> (i32, i32) {
    %c0_i32 = arith.constant 0 : i32
    %c0_i32_0 = arith.constant 0 : i32
    %c0_i32_1 = arith.constant 0 : i32
    return %c0_i32, %c0_i32_0 : i32, i32
  }
  func.func @transform_7(%arg0: i32) -> (i32, i32) {
    %c0_i32 = arith.constant 0 : i32
    %c0_i32_0 = arith.constant 0 : i32
    %c0_i32_1 = arith.constant 0 : i32
    return %c0_i32, %c0_i32_0 : i32, i32
  }
  func.func @transform_8(%arg0: i32) -> (i32, i32) {
    %c0_i32 = arith.constant 0 : i32
    %c0_i32_0 = arith.constant 0 : i32
    return %arg0, %c0_i32 : i32, i32
  }
}

</mosaic_0001>

<bundles_post_ra>
// kernel: tpu_custom_call.1
= control target key start
LH: loop header
LB: loop body
LE: loop exit
PB: predicated region body
PF: predicated region fallthrough
CT: control target
= control target key end

     0   :  { %13 = vsyncpa [#allocation3], 0  ;;  %s849_s0 = inlined_call_operand.hbm [shape: f32[2,8,32], index: 0, kind: input, shape index: {}]   ;;  %s850_s1 = inlined_call_operand.vmem [shape: s32[2,1], index: 1, kind: input, shape index: {}]   ;;  %s851_s2 = inlined_call_operand.vmem [shape: f32[32,32], index: 2, kind: input, shape index: {}]   ;;  %s852_s3 = inlined_call_operand.vmem [shape: f32[1,32], index: 3, kind: input, shape index: {}]   ;;  %s853_s4 = inlined_call_operand.vmem [shape: f32[32,4], index: 4, kind: input, shape index: {}]   ;;  %s854_s5 = inlined_call_operand.vmem [shape: f32[1,4], index: 5, kind: input, shape index: {}]   ;;  %s855_s6 = inlined_call_operand.hbm [shape: f32[32,128], index: 6, kind: input, shape index: {}]   ;;  %s856_s7 = inlined_call_operand.vmem [shape: f32[4,128], index: 7, kind: input, shape index: {}]   ;;  %s857_s8 = inlined_call_operand.hbm [shape: f32[2,128], index: 8, kind: output, shape index: {}]  }
   0x1   :  { %14 = vsyncpa [#allocation6], 0 }
   0x2   :  { %15 = vsyncpa [#allocation4], 0  ;;  %s713_s27 = smov [#allocation2]   ;;  %s641_s9 = scalar_lea.hbm %s849_s0, 256 }
   0x3   :  { %s21_s28 = sshll.u32 %s713_s27, 4  ;;  %p642_p0 = scmp.ne.s32.totalorder %s849_s0, %s641_s9  ;;  %s22_s28 = int_to_ptr.vmem [resolvable:$true] %s21_s28 }
   0x4   :  { %p645_p1 = scmp.lt.u32.totalorder %s641_s9, %s849_s0 }
   0x6   :  { %p647_p2 = pnand %p645_p1, %p642_p0 }
   0x8   :  { %650 = shalt.err (!%p647_p2)
}
   0x9   :  { %s651_s14 = scalar_lea.vmem %s22_s28, 256  ;;  %p656_p4 = scmp.lt.s32.totalorder %s22_s28, %s22_s28 }
   0xa   :  { %p652_p3 = scmp.ne.s32.totalorder %s22_s28, %s651_s14  ;;  %p657_p5 = scmp.lt.s32.totalorder %s651_s14, %s651_s14 }
   0xc   :  { %p658_p6 = por %p657_p5, %p656_p4 }
   0xe   :  { %p659_p7 = pnand %p658_p6, %p652_p3 }
  0x10   :  { %662 = shalt.err (!%p659_p7)
}
  0x11   :  { %s714_s15 = smov 128   ;;  %s715_s16 = smov 8  }
  0x12   :  { %27 = dma.hbm_to_vmem [thread:$0]  %s849_s0, 256, %s22_s28, [#allocation3], %s714_s15, %s714_s15, %s715_s16  }
  0x13   :  { %s716_s19 = smov [#allocation5]   ;;  %s663_s23 = scalar_lea.hbm %s855_s6, 512 }
  0x14   :  { %s43_s20 = sshll.u32 %s716_s19, 4  ;;  %p664_p8 = scmp.ne.s32.totalorder %s855_s6, %s663_s23  ;;  %s44_s20 = int_to_ptr.vmem [resolvable:$true] %s43_s20 }
  0x15   :  { %p667_p9 = scmp.lt.u32.totalorder %s663_s23, %s855_s6 }
  0x17   :  { %p669_p10 = pnand %p667_p9, %p664_p8 }
  0x19   :  { %672 = shalt.err (!%p669_p10)
}
  0x1a   :  { %s673_s29 = scalar_lea.vmem %s44_s20, 512  ;;  %p678_p12 = scmp.lt.s32.totalorder %s44_s20, %s44_s20 }
  0x1b   :  { %p674_p11 = scmp.ne.s32.totalorder %s44_s20, %s673_s29  ;;  %p679_p13 = scmp.lt.s32.totalorder %s673_s29, %s673_s29 }
  0x1d   :  { %p680_p0 = por %p679_p13, %p678_p12 }
  0x1f   :  { %p681_p1 = pnand %p680_p0, %p674_p11 }
  0x21   :  { %684 = shalt.err (!%p681_p1)
}
  0x22   :  { %49 = dma.hbm_to_vmem [thread:$0]  %s855_s6, 512, %s44_s20, [#allocation6], %s714_s15, %s714_s15, %s715_s16  }
  0x23   :  { %707 = dma.done.wait [#allocation3], 256  }
  0x24   :  { %708 = vsyncadd [#allocation3], 4294967040 }
  0x25   :  { %709 = dma.done.wait [#allocation6], 512  }
  0x26   :  { %710 = vsyncadd [#allocation6], 4294966784  ;;  %vm71_vm0 = vcmask 261120   ;;  %v60_v0 = vld [vmem:[%s851_s2] sm:$0xff]  ;;  %v61_v1 = vld [vmem:[%s851_s2 + $0x8] sm:$0xff]  ;;  %v247_v14 = vlaneseq  ;;  %v717_v15 = vmov 0  }
  0x27   :  { %v62_v2 = vld [vmem:[%s851_s2 + $0x10] sm:$0xff]  ;;  %v601_v3 = vpack.c.bf16 %v61_v1, %v60_v0  ;;  %v63_v4 = vld [vmem:[%s851_s2 + $0x18] sm:$0xff]  ;;  %v58_v5 = vld [vmem:[#allocation2] sm:$0xff]  ;;  %632 = vset.pattern.permute.xlu0 %v717_v15  ;;  %v718_v17 = vmov 1966171168   ;;  %vm415_vm1 = vcmask 1043456  }
  0x28   :  { %v605_v6 = vpack.c.bf16 %v63_v4, %v62_v2  ;;  %571 = vmatprep.mubr.msk.f32.mxu0 %vm71_vm0, %v58_v5  ;;  %v155_v7 = vld [vmem:[%s853_s4] sm:$0xff]  ;;  %v156_v8 = vld [vmem:[%s853_s4 + $0x8] sm:$0xff]  ;;  %v157_v11 = vld [vmem:[%s853_s4 + $0x10] sm:$0xff]  ;;  %v248_v16 = vshrl.u32 %v247_v14, 7  ;;  %v259_v18 = vunpack.c.l.s4 %v718_v17  ;;  %vm290_vm2 = vcmask 31744  }
  0x29   :  { %602 = vmatprep.subr.bf16.mxu0 %v601_v3  ;;  %v609_v9 = vpack.c.bf16 %v156_v8, %v155_v7  ;;  %v59_v10 = vld [vmem:[#allocation2 + $0x8] sm:$0xff]  ;;  %v158_v12 = vld [vmem:[%s853_s4 + $0x18] sm:$0xff]  ;;  %v536_v19 = vld.sshfl [vmem:[%s850_s1] sm:$0x11 pattern:$0x75316420] }
  0x2a   :  { %604 = vmatpush3.bf16.msra.mxu0 %v601_v3  ;;  %v613_v13 = vpack.c.bf16 %v158_v12, %v157_v11  ;;  %v260_v20 = vunpack.c.0.s8 %v259_v18  ;;  %v257_v21 = vcombine.high %v536_v19, %v536_v19  ;;  %v274_v23 = vsub.s32 0, %v248_v16  ;;  %v530_v28 = vld [vmem:[%s852_s3] ss:$0 sm:$0xff]  ;;  %v329_v35 = vld [vmem:[#allocation5] sm:$0xff]  ;;  %v330_v36 = vld [vmem:[#allocation5 + $0x8] sm:$0xff] }
  0x2b   :  { %606 = vmatprep.subr.bf16.mxu0 %v605_v6  ;;  %610 = vmatprep.subr.bf16.mxu1 %v609_v9  ;;  %v331_v37 = vld [vmem:[#allocation5 + $0x10] sm:$0xff]  ;;  %v617_v38 = vpack.c.bf16 %v330_v36, %v329_v35  ;;  %v332_v39 = vld [vmem:[#allocation5 + $0x18] sm:$0xff]  ;;  %vm510_vm5 = vcmask 1041409  }
  0x2c   :  { %612 = vmatpush3.bf16.msra.mxu1 %v609_v9  ;;  %v263_v22 = vsub.s32 %v260_v20, %v248_v16  ;;  %v408_v40 = vld [vmem:[%s856_s7] sm:$0xf]  ;;  %v621_v41 = vpack.c.bf16 %v332_v39, %v331_v37 }
  0x2d   :  { %614 = vmatprep.subr.bf16.mxu1 %v613_v13  ;;  %v533_v43 = vld [vmem:[%s854_s5] ss:$0 sm:$0xff]  ;;  %s719_s5 = smov [#allocation7]  }
  0x2e   :  { %608 = vmatpush3.bf16.msra.mxu0 %v605_v6  ;;  %v264_v24 = vrot.slane %v536_v19, %v263_v22  ;;  %v271_v25 = vrot.slane %v257_v21, %v263_v22  ;;  %s520_s7 = sshll.u32 %s719_s5, 4  ;;  %s521_s7 = int_to_ptr.vmem [resolvable:$true] %s520_s7 }
  0x2f   :  { %618 = vmatprep.subr.bf16.mxu0 %v617_v38  ;;  %s685_s27 = scalar_lea.vmem %s521_s7, 32  ;;  %p690_p3 = scmp.lt.s32.totalorder %s521_s7, %s521_s7 }
  0x30   :  { %616 = vmatpush3.bf16.msra.mxu1 %v613_v13  ;;  %v275_v26 = vrot.slane %v264_v24, %v274_v23  ;;  %v279_v27 = vrot.slane %v271_v25, %v274_v23  ;;  %p686_p2 = scmp.ne.s32.totalorder %s521_s7, %s685_s27  ;;  %p691_p4 = scmp.lt.s32.totalorder %s685_s27, %s685_s27 }
  0x31   :  { %572 = vmatmul.mubr.msk.f32.vlgmr.msra.gmra.mrb[0].mxu0 %vm71_vm0, %v59_v10  ;;  %596 = vmatprep.subr.msk.mxu1 %vm415_vm1, %v408_v40 }
  0x32   :  { %593 = vmatprep.mubr.msk.f32.mxu0 %vm71_vm0, %v58_v5  ;;  %281 = vperm.xlu0 %632, %v275_v26   ;;  %p692_p5 = por %p691_p4, %p690_p3 }
  0x33   :  { %620 = vmatpush3.bf16.msra.mxu0 %v617_v38 }
  0x34   :  { %622 = vmatprep.subr.bf16.mxu0 %v621_v41  ;;  %p693_p6 = pnand %p692_p5, %p686_p2 }
  0x36   :  { %284 = vperm.xlu0 %632, %v279_v27  }
  0x37   :  { %624 = vmatpush3.bf16.msra.mxu0 %v621_v41 }
  0x3a   :  { %594 = vmatmul.mubr.msk.f32.vlgmr.msra.gmra.mrb[2].mxu0 %vm71_vm0, %v59_v10 }
  0xb1   :  { %v282_v42 = vpop.permute.xlu0 %281 }
  0xb2   :  { %vm286_vm4 = vcmp.lt.s32.totalorder %v248_v16, %v282_v42 }
  0xb5   :  { %v285_v44 = vpop.permute.xlu0 %284 }
  0xb6   :  { %vm287_vm3 = vcmp.lt.s32.totalorder %v248_v16, %v285_v44 }
 0x104   :  { %v573_v29 = vpop.f32.mrb[0].mxu0 }
 0x105   :  { %v150_v30 = vadd.f32 %v573_v29, %v530_v28  ;;  %v144_v31 = vpop.f32.mrb[1].mxu0 }
 0x106   :  { %v145_v32 = vadd.f32 %v530_v28, %v144_v31 }
 0x107   :  { %v154_v34 = vmax.f32 %v150_v30, 0.0 }
 0x108   :  { %v153_v33 = vmax.f32 %v145_v32, 0.0 }
 0x10a   :  { %582 = vmatprep.mubr.msk.f32.mxu1 %vm71_vm0, %v153_v33 }
 0x10b   :  { %583 = vmatmul.mubr.msk.f32.vlgmr.msra.gmra.mrb[0].mxu1 %vm71_vm0, %v154_v34 }
 0x10c   :  { %597 = vmatpush3.msk.msra.mxu1 %vm415_vm1, %v408_v40 }
 0x10d   :  { %v595_v25 = vpop.f32.mrb[2].mxu0 }
 0x10e   :  { %v399_v26 = vpop.f32.mrb[3].mxu0 }
 0x1de   :  { %v584_v45 = vpop.f32.mrb[0].mxu1 }
 0x1df   :  { %v244_v46 = vadd.f32 %v584_v45, %v533_v43  ;;  %v238_v47 = vpop.f32.mrb[1].mxu1 }
 0x1e0   :  { %v239_v48 = vadd.f32 %v533_v43, %v238_v47 }
 0x1e1   :  { %v289_v49 = vsel %vm287_vm3, %v244_v46, -1e+30 }
 0x1e2   :  { %v298_v50 = vsel %vm290_vm2, %v289_v49, -inf  ;;  %v288_v51 = vsel %vm286_vm4, %v239_v48, -1e+30 }
 0x1e3   :  { %v299_v52 = vrot.slane %v298_v50, 4  ;;  %v291_v53 = vsel %vm290_vm2, %v288_v51, -inf }
 0x1e4   :  { %v292_v54 = vrot.slane %v291_v53, 4 }
 0x1e5   :  { %v300_v55 = vmax.f32 %v298_v50, %v299_v52 }
 0x1e6   :  { %v293_v56 = vmax.f32 %v291_v53, %v292_v54 }
 0x1e7   :  { %v301_v57 = vrot.slane %v300_v55, 2 }
 0x1e8   :  { %v294_v58 = vrot.slane %v293_v56, 2 }
 0x1e9   :  { %v302_v59 = vmax.f32 %v300_v55, %v301_v57 }
 0x1ea   :  { %v295_v60 = vmax.f32 %v293_v56, %v294_v58 }
 0x1eb   :  { %v303_v61 = vrot.slane %v302_v59, 1 }
 0x1ec   :  { %v296_v62 = vrot.slane %v295_v60, 1 }
 0x1ed   :  { %v304_v63 = vmax.f32 %v302_v59, %v303_v61 }
 0x1ee   :  { %v297_v0 = vmax.f32 %v295_v60, %v296_v62 }
 0x1ef   :  { %v306_v1 = vsub.f32 %v289_v49, %v304_v63 }
 0x1f0   :  { %v305_v2 = vsub.f32 %v288_v51, %v297_v0 }
 0x1f1   :  { %v309_v3 = vmul.f32 1.442695, %v306_v1 }
 0x1f2   :  { %v307_v4 = vmul.f32 1.442695, %v305_v2 }
 0x1f3   :  { %633 = vpow2.f32 %v309_v3 }
 0x1f4   :  { %635 = vpow2.f32 %v307_v4 }
 0x1fd   :  { %v634_v5 = vpop.eup %633 }
 0x1fe   :  { %v636_v6 = vpop.eup %635  ;;  %v318_v7 = vsel %vm290_vm2, %v634_v5, 0.0 }
 0x1ff   :  { %v319_v8 = vrot.slane %v318_v7, 4  ;;  %v311_v9 = vsel %vm290_vm2, %v636_v6, 0.0 }
 0x200   :  { %v312_v10 = vrot.slane %v311_v9, 4 }
 0x201   :  { %v320_v11 = vadd.f32 %v319_v8, %v318_v7 }
 0x202   :  { %v313_v12 = vadd.f32 %v312_v10, %v311_v9 }
 0x203   :  { %v321_v13 = vrot.slane %v320_v11, 2 }
 0x204   :  { %v314_v14 = vrot.slane %v313_v12, 2 }
 0x205   :  { %v322_v15 = vadd.f32 %v321_v13, %v320_v11 }
 0x206   :  { %v315_v16 = vadd.f32 %v314_v14, %v313_v12 }
 0x207   :  { %v323_v17 = vrot.slane %v322_v15, 1 }
 0x208   :  { %v316_v18 = vrot.slane %v315_v16, 1 }
 0x209   :  { %v324_v19 = vadd.f32 %v323_v17, %v322_v15 }
 0x20a   :  { %v317_v20 = vadd.f32 %v316_v18, %v315_v16 }
 0x20b   :  { %637 = vrcp.f32 %v324_v19 }
 0x20c   :  { %639 = vrcp.f32 %v317_v20 }
 0x215   :  { %v638_v21 = vpop.eup %637 }
 0x216   :  { %v640_v22 = vpop.eup %639  ;;  %v328_v24 = vmul.f32 %v638_v21, %v634_v5 }
 0x217   :  { %v326_v23 = vmul.f32 %v640_v22, %v636_v6 }
 0x219   :  { %598 = vmatprep.mubr.msk.f32.mxu1 %vm290_vm2, %v326_v23 }
 0x21a   :  { %599 = vmatmul.mubr.msk.f32.vlgmr.msra.gmra.mrb[2].mxu1 %vm290_vm2, %v328_v24 }
 0x2ed   :  { %v600_v27 = vpop.f32.mrb[2].mxu1 }
 0x2ee   :  { %v495_v28 = vmul.f32 %v600_v27, %v595_v25  ;;  %v485_v29 = vpop.f32.mrb[3].mxu1 }
 0x2ef   :  { %v494_v30 = vmul.f32 %v485_v29, %v399_v26 }
 0x2f0   :  { %v502_v31 = vrot.slane %v495_v28, 4 }
 0x2f1   :  { %v496_v32 = vrot.slane %v494_v30, 4 }
 0x2f2   :  { %v503_v33 = vadd.f32 %v502_v31, %v495_v28 }
 0x2f3   :  { %v497_v34 = vadd.f32 %v496_v32, %v494_v30 }
 0x2f4   :  { %v504_v35 = vrot.slane %v503_v33, 2 }
 0x2f5   :  { %v498_v36 = vrot.slane %v497_v34, 2 }
 0x2f6   :  { %v505_v37 = vadd.f32 %v504_v35, %v503_v33 }
 0x2f7   :  { %v499_v38 = vadd.f32 %v498_v36, %v497_v34 }
 0x2f8   :  { %v506_v39 = vrot.slane %v505_v37, 1 }
 0x2f9   :  { %v500_v40 = vrot.slane %v499_v38, 1 }
 0x2fa   :  { %v507_v41 = vadd.f32 %v506_v39, %v505_v37 }
 0x2fb   :  { %v501_v42 = vadd.f32 %v500_v40, %v499_v38 }
 0x2fd   :  { %v511_v43 = vsel %vm510_vm5, %v507_v41, %v501_v42 }
 0x2fe   :  { %513 = vst [vmem:[#allocation7] sm:$0x3] %v511_v43 }
 0x2ff   :  { %696 = shalt.err (!%p693_p6)
}
 0x300   :  { %s697_s28 = scalar_lea.hbm %s857_s8, 32 }
 0x301   :  { %p698_p7 = scmp.ne.s32.totalorder %s857_s8, %s697_s28  ;;  %p701_p8 = scmp.lt.u32.totalorder %s697_s28, %s857_s8 }
 0x303   :  { %p703_p9 = pnand %p701_p8, %p698_p7 }
 0x305   :  { %706 = shalt.err (!%p703_p9)
}
 0x306   :  { %523 = dma.vmem_to_hbm [thread:$0]  %s521_s7, 32, %s857_s8, [#allocation4]  }
 0x307   :  { %711 = dma.done.wait [#allocation4], 32  }
 0x308   :  { %712 = vsyncadd [#allocation4], 4294967264 }
 0x309   :  { %527 = vsyncpa [#allocation3], 1 }
 0x30a   :  { %528 = vsyncpa [#allocation6], 1 }
 0x30b   :  { %529 = vsyncpa [#allocation4], 1 }

</bundles_post_ra>
